<compile_context>
chip_gen: v5e
topology: v5e:2x2
jax: 0.10.0
libtpu: 0.0.40
codegen_flags: <defaults>
</compile_context>

<pallas_src>
import functools

import jax
import jax.numpy as jnp
from jax.experimental import pallas as pl
from jax.experimental.pallas import tpu as pltpu


# ---------------------------------------------------------------------------
# Kernel 1: hoisted LSTM input projection, one grid step per gate (parallel).
#   out[g] = x @ W_ih_g^T + (b_ih_g + b_hh_g)          x: (T*B, E)  out: (4, T*B, H)
# ---------------------------------------------------------------------------
def _gate_proj_kernel(x_ref, w_ref, b_ref, o_ref):
    o_ref[0] = (jnp.dot(x_ref[...], w_ref[0], preferred_element_type=jnp.float32)
                + b_ref[0]).astype(o_ref.dtype)


def gate_input_projection(x_tb_e, wih4, b4):
    m, e = x_tb_e.shape
    _, _, hl = wih4.shape
    return pl.pallas_call(
        _gate_proj_kernel,
        out_shape=jax.ShapeDtypeStruct((4, m, hl), jnp.float32),
        grid=(4,),
        in_specs=[
            pl.BlockSpec((m, e), lambda g: (0, 0)),        # x (shared)
            pl.BlockSpec((1, e, hl), lambda g: (g, 0, 0)),  # W_ih^T per gate
            pl.BlockSpec((1, 1, hl), lambda g: (g, 0, 0)),  # bias per gate
        ],
        out_specs=pl.BlockSpec((1, m, hl), lambda g: (g, 0, 0)),
        compiler_params=pltpu.CompilerParams(dimension_semantics=("parallel",)),
    )(x_tb_e, wih4, b4)


# ---------------------------------------------------------------------------
# Kernel 2: LSTM recurrence (final hidden state only) + fused attribute projection.
# Single invocation, unrolled fori_loop over the short attribute sequence.
# PyTorch gate order (i, f, g, o); h0 = c0 = 0.
# ---------------------------------------------------------------------------
def _lstm_attr_kernel(gx_ref, whh_ref, wattr_ref, battr_ref, o_ref, *, seq_len):
    batch = gx_ref.shape[2]
    hidden = gx_ref.shape[3]

    def step(t, carry):
        h, c = carry
        pre_i = gx_ref[0, t] + jnp.dot(h, whh_ref[0], preferred_element_type=jnp.float32)
        pre_f = gx_ref[1, t] + jnp.dot(h, whh_ref[1], preferred_element_type=jnp.float32)
        pre_g = gx_ref[2, t] + jnp.dot(h, whh_ref[2], preferred_element_type=jnp.float32)
        pre_o = gx_ref[3, t] + jnp.dot(h, whh_ref[3], preferred_element_type=jnp.float32)
        i_g = jax.nn.sigmoid(pre_i)
        f_g = jax.nn.sigmoid(pre_f)
        g_g = jnp.tanh(pre_g)
        o_g = jax.nn.sigmoid(pre_o)
        c_new = f_g * c + i_g * g_g
        h_new = o_g * jnp.tanh(c_new)
        return h_new, c_new

    h0 = jnp.zeros((batch, hidden), jnp.float32)
    h_final, _ = jax.lax.fori_loop(0, seq_len, step, (h0, h0), unroll=True)
    o_ref[...] = jnp.tanh(
        jnp.dot(h_final, wattr_ref[...], preferred_element_type=jnp.float32)
        + battr_ref[...]
    ).astype(o_ref.dtype)


def lstm_attr_projection(gates_x, whh4, wattr_t, battr):
    _, t, b, hl = gates_x.shape
    p = wattr_t.shape[-1]
    return pl.pallas_call(
        functools.partial(_lstm_attr_kernel, seq_len=t),
        out_shape=jax.ShapeDtypeStruct((b, p), jnp.float32),
        grid=(1,),
        in_specs=[
            pl.BlockSpec((4, t, b, hl), lambda i: (0, 0, 0, 0)),
            pl.BlockSpec((4, hl, hl), lambda i: (0, 0, 0)),
            pl.BlockSpec((hl, p), lambda i: (0, 0)),
            pl.BlockSpec((1, p), lambda i: (0, 0)),
        ],
        out_specs=pl.BlockSpec((b, p), lambda i: (0, 0)),
        compiler_params=pltpu.CompilerParams(dimension_semantics=("arbitrary",)),
    )(gates_x, whh4, wattr_t, battr)


# ---------------------------------------------------------------------------
# Kernel 3: fused image path + attention + softmax, one batch element per grid step.
# Layout: channels on sublanes, (padded) spatial flattened onto the lane axis, so the
# 3x3 conv is 9 shifted lane-slices each feeding a (C_enc, C) x (C, Nwork) matmul.
# Nwork = H*(W+2); the W..W+1 "wrap" columns of each row are garbage and are masked
# out of the softmax.
# ---------------------------------------------------------------------------
def _image_attn_kernel(x_ref, wc_ref, bc_ref, wp_ref, bp_ref, attr_ref, mask_ref, o_ref,
                       *, width_pad, n_work):
    c_enc = wc_ref.shape[1]
    xflat = x_ref[0]                                   # (C, n_pad)
    acc = jnp.zeros((c_enc, n_work), jnp.float32)
    for kh in range(3):
        for kw in range(3):
            start = kh * width_pad + kw
            xs = xflat[:, start:start + n_work]        # (C, n_work) shifted view
            acc = acc + jnp.dot(wc_ref[kh * 3 + kw], xs,
                                preferred_element_type=jnp.float32)
    enc = jnp.maximum(acc + bc_ref[...], 0.0)          # conv3x3(pad=1) + ReLU: (C_enc, n_work)
    proj = jnp.tanh(jnp.dot(wp_ref[...], enc, preferred_element_type=jnp.float32)
                    + bp_ref[...])                     # tanh(image_projection): (P, n_work)
    scores = jnp.dot(attr_ref[0], proj, preferred_element_type=jnp.float32)  # (1, n_work)
    scores = jnp.where(mask_ref[...] > 0, scores, -1e30)
    m = jnp.max(scores, axis=1, keepdims=True)
    e = jnp.exp(scores - m) * mask_ref[...]
    denom = jnp.sum(e, axis=1, keepdims=True)
    o_ref[0] = (e / denom).astype(o_ref.dtype)


def image_attention(x_flat, wconv9, bconv, wproj, bproj, attr_b1p, mask, *, width_pad):
    b, c_in, n_pad = x_flat.shape
    c_enc = wconv9.shape[1]
    p = wproj.shape[0]
    n_work = mask.shape[-1]
    kernel = functools.partial(_image_attn_kernel, width_pad=width_pad, n_work=n_work)
    return pl.pallas_call(
        kernel,
        out_shape=jax.ShapeDtypeStruct((b, 1, n_work), jnp.float32),
        grid=(b,),
        in_specs=[
            pl.BlockSpec((1, c_in, n_pad), lambda i: (i, 0, 0)),   # flattened padded image
            pl.BlockSpec((9, c_enc, c_in), lambda i: (0, 0, 0)),   # conv taps
            pl.BlockSpec((c_enc, 1), lambda i: (0, 0)),            # conv bias
            pl.BlockSpec((p, c_enc), lambda i: (0, 0)),            # image projection W
            pl.BlockSpec((p, 1), lambda i: (0, 0)),                # image projection b
            pl.BlockSpec((1, 1, p), lambda i: (i, 0, 0)),          # projected attributes
            pl.BlockSpec((1, n_work), lambda i: (0, 0)),           # valid-column mask
        ],
        out_specs=pl.BlockSpec((1, 1, n_work), lambda i: (i, 0, 0)),
        compiler_params=pltpu.CompilerParams(dimension_semantics=("parallel",)),
    )(x_flat, wconv9, bconv, wproj, bproj, attr_b1p, mask)


# ---------------------------------------------------------------------------
# Full forward pass.
# ---------------------------------------------------------------------------
def dale_attribute_attention_forward(params, image, attribute_tensor):
    b, c_in, h, w = image.shape
    t = attribute_tensor.shape[1]
    hl = params["whh4"].shape[-1]
    wp = w + 2                                  # padded row width

    # ----- attribute path: embedding -> hoisted gate projection -> LSTM -> tanh projection
    # TODO(synk): embedding gather stays in XLA (jnp.take); no clean win from a Pallas gather here.
    emb = jnp.take(params["emb"], attribute_tensor, axis=0)           # (B, T, E)
    x_tb_e = jnp.transpose(emb, (1, 0, 2)).reshape(t * b, -1)         # time-major (T*B, E)
    gx = gate_input_projection(x_tb_e, params["wih4"], params["b4"])  # (4, T*B, Hl)
    gx = gx.reshape(4, t, b, hl)
    attr_proj = lstm_attr_projection(gx, params["whh4"],
                                     params["wattr_t"], params["battr"])  # (B, P)

    # ----- image path (conv + relu + projection + tanh + attention dot + softmax, fused)
    # zero pad: 1 top / 1 left / 1 right (conv pad=1) + 1 extra bottom row so that the
    # shifted flat lane-slices stay in bounds.
    img_pad = jnp.pad(image, ((0, 0), (0, 0), (1, 2), (1, 1)))        # (B, C, H+3, W+2)
    img_flat = img_pad.reshape(b, c_in, (h + 3) * wp)                 # (B, C, n_pad)
    n_work = h * wp
    col = jnp.arange(n_work, dtype=jnp.int32) % wp
    mask = (col < w).astype(jnp.float32).reshape(1, n_work)
    probs = image_attention(img_flat, params["wconv9"], params["bconv"],
                            params["wproj"], params["bproj"],
                            attr_proj.reshape(b, 1, -1), mask, width_pad=wp)  # (B, 1, n_work)
    # drop the masked wrap columns -> (B, H*W) with the PyTorch flatten order h*W + w
    return probs.reshape(b, h, wp)[:, :, :w].reshape(b, h * w)


# ---------------------------------------------------------------------------
# Parameter init (PyTorch-native shapes) + one-time layout preparation.
# ---------------------------------------------------------------------------
def init_params(key, *, c_in, c_enc, projection, vocab, emb_dim, lstm_hidden):
    ks = jax.random.split(key, 11)
    s = 0.1
    return {
        "conv_w": s * jax.random.normal(ks[0], (c_enc, c_in, 3, 3), jnp.float32),
        "conv_b": s * jax.random.normal(ks[1], (c_enc,), jnp.float32),
        "img_proj_w": s * jax.random.normal(ks[2], (projection, c_enc), jnp.float32),
        "img_proj_b": s * jax.random.normal(ks[3], (projection,), jnp.float32),
        "emb": s * jax.random.normal(ks[4], (vocab, emb_dim), jnp.float32),
        "w_ih": s * jax.random.normal(ks[5], (4 * lstm_hidden, emb_dim), jnp.float32),
        "w_hh": s * jax.random.normal(ks[6], (4 * lstm_hidden, lstm_hidden), jnp.float32),
        "b_ih": s * jax.random.normal(ks[7], (4 * lstm_hidden,), jnp.float32),
        "b_hh": s * jax.random.normal(ks[8], (4 * lstm_hidden,), jnp.float32),
        "attr_proj_w": s * jax.random.normal(ks[9], (projection, lstm_hidden), jnp.float32),
        "attr_proj_b": s * jax.random.normal(ks[10], (projection,), jnp.float32),
    }


def prepare_params(p):
    c_enc, c_in, _, _ = p["conv_w"].shape
    four_h, emb_dim = p["w_ih"].shape
    hl = four_h // 4
    proj = p["img_proj_w"].shape[0]
    return {
        # conv taps: [kh*3+kw] -> (C_enc, C_in), i.e. conv_w[:, :, kh, kw]
        "wconv9": jnp.transpose(p["conv_w"], (2, 3, 0, 1)).reshape(9, c_enc, c_in),
        "bconv": p["conv_b"].reshape(c_enc, 1),
        "wproj": p["img_proj_w"],                                   # (P, C_enc)
        "bproj": p["img_proj_b"].reshape(proj, 1),
        "emb": p["emb"],
        # per-gate (i, f, g, o) transposed LSTM weights; biases pre-summed (b_ih + b_hh)
        "wih4": jnp.transpose(p["w_ih"].reshape(4, hl, emb_dim), (0, 2, 1)),  # (4, E, H)
        "whh4": jnp.transpose(p["w_hh"].reshape(4, hl, hl), (0, 2, 1)),       # (4, H, H)
        "b4": (p["b_ih"] + p["b_hh"]).reshape(4, 1, hl),
        "wattr_t": jnp.transpose(p["attr_proj_w"]),                 # (H, P)
        "battr": p["attr_proj_b"].reshape(1, proj),
    }


if __name__ == "__main__":
    B, C_IN, H, W = 2, 4, 16, 16
    C_ENC = 8                 # image encoder output channels (concretized ImageEncoder)
    PROJECTION = 32           # shared projection dim of image/attribute projections
    ENCODER_VOCAB = 16
    ENCODER_EMBEDDING = 16
    ENCODER_OUT = 32          # LSTM hidden size
    N_ATTRIBUTES = 3          # shape, size, color

    key = jax.random.PRNGKey(0)
    k_img, k_attr, k_par = jax.random.split(key, 3)

    image = jax.random.normal(k_img, (B, C_IN, H, W), jnp.float32)                 # NCHW
    attributes = jax.random.randint(k_attr, (B, N_ATTRIBUTES), 0, ENCODER_VOCAB,
                                    jnp.int32)                                     # (B, T)

    params = prepare_params(init_params(
        k_par, c_in=C_IN, c_enc=C_ENC, projection=PROJECTION,
        vocab=ENCODER_VOCAB, emb_dim=ENCODER_EMBEDDING, lstm_hidden=ENCODER_OUT))

    out = dale_attribute_attention_forward(params, image, attributes)
    out = jax.block_until_ready(out)
    assert out.shape == (B, H * W), out.shape
    assert bool(jnp.all(jnp.isfinite(out)))
    assert bool(jnp.allclose(jnp.sum(out, axis=1), 1.0, atol=1e-4))   # valid softmax rows
    print("KERNEL_OK")
</pallas_src>

<mosaic_0001>
module attributes {stable_mosaic.version = 11 : i64} {
  func.func @_gate_proj_kernel(%arg0: i32, %arg1: memref<6x16xf32, #tpu.memory_space<vmem>>, %arg2: memref<1x16x32xf32, #tpu.memory_space<vmem>>, %arg3: memref<1x1x32xf32, #tpu.memory_space<vmem>>, %arg4: memref<1x6x32xf32, #tpu.memory_space<vmem>>) attributes {dimension_semantics = [#tpu.dimension_semantics<parallel>], iteration_bounds = array<i64: 4>, scalar_prefetch = 0 : i64, scratch_operands = 0 : i64, tpu.core_type = #tpu.core_type<tc>, window_params = [{pipeline_mode = #tpu.pipeline_mode<synchronous>, transform_indices = @transform_0, window_bounds = array<i64: 6, 16>}, {transform_indices = @transform_1, window_bounds = array<i64: 1, 16, 32>}, {transform_indices = @transform_2, window_bounds = array<i64: 1, 1, 32>}, {transform_indices = @transform_3, window_bounds = array<i64: 1, 6, 32>}]} {
    %c0 = arith.constant 0 : index
    %c0_0 = arith.constant 0 : index
    %0 = vector.load %arg1[%c0, %c0_0] : memref<6x16xf32, #tpu.memory_space<vmem>>, vector<6x16xf32>
    %c0_1 = arith.constant 0 : index
    %c0_2 = arith.constant 0 : index
    %c0_3 = arith.constant 0 : index
    %1 = vector.load %arg2[%c0_1, %c0_2, %c0_3] : memref<1x16x32xf32, #tpu.memory_space<vmem>>, vector<1x16x32xf32>
    %2 = vector.shape_cast %1 : vector<1x16x32xf32> to vector<16x32xf32>
    %cst = arith.constant dense<0.000000e+00> : vector<6x32xf32>
    %3 = tpu.matmul %0, %2, %cst {dimension_numbers = #tpu.dot_dimension_numbers<[1], [0], [0], [1], [0, 0, 1, 1], [], []>} : vector<6x16xf32>, vector<16x32xf32>, vector<6x32xf32> -> vector<6x32xf32>
    %c0_4 = arith.constant 0 : index
    %c0_5 = arith.constant 0 : index
    %c0_6 = arith.constant 0 : index
    %4 = vector.load %arg3[%c0_4, %c0_5, %c0_6] : memref<1x1x32xf32, #tpu.memory_space<vmem>>, vector<1x1x32xf32>
    %5 = vector.shape_cast %4 : vector<1x1x32xf32> to vector<1x32xf32>
    %6 = vector.broadcast %5 : vector<1x32xf32> to vector<6x32xf32>
    %7 = arith.addf %3, %6 : vector<6x32xf32>
    %c0_7 = arith.constant 0 : index
    %c0_8 = arith.constant 0 : index
    %c0_9 = arith.constant 0 : index
    %8 = vector.load %arg4[%c0_7, %c0_8, %c0_9] : memref<1x6x32xf32, #tpu.memory_space<vmem>>, vector<1x6x32xf32>
    %9 = vector.shape_cast %8 : vector<1x6x32xf32> to vector<6x32xf32>
    %10 = vector.shape_cast %7 : vector<6x32xf32> to vector<1x6x32xf32>
    tpu.vector_store %arg4[%c0_7, %c0_8, %c0_9], %10 {strides = array<i32>} : memref<1x6x32xf32, #tpu.memory_space<vmem>>, vector<1x6x32xf32>,
    return
  }
  func.func @transform_0(%arg0: i32) -> (i32, i32) {
    %c0_i32 = arith.constant 0 : i32
    %c0_i32_0 = arith.constant 0 : i32
    %c0_i32_1 = arith.constant 0 : i32
    return %c0_i32, %c0_i32_0 : i32, i32
  }
  func.func @transform_1(%arg0: i32) -> (i32, i32, i32) {
    %c0_i32 = arith.constant 0 : i32
    %c0_i32_0 = arith.constant 0 : i32
    %c0_i32_1 = arith.constant 0 : i32
    return %arg0, %c0_i32, %c0_i32_0 : i32, i32, i32
  }
  func.func @transform_2(%arg0: i32) -> (i32, i32, i32) {
    %c0_i32 = arith.constant 0 : i32
    %c0_i32_0 = arith.constant 0 : i32
    %c0_i32_1 = arith.constant 0 : i32
    return %arg0, %c0_i32, %c0_i32_0 : i32, i32, i32
  }
  func.func @transform_3(%arg0: i32) -> (i32, i32, i32) {
    %c0_i32 = arith.constant 0 : i32
    %c0_i32_0 = arith.constant 0 : i32
    %c0_i32_1 = arith.constant 0 : i32
    return %arg0, %c0_i32, %c0_i32_0 : i32, i32, i32
  }
}

</mosaic_0001>

<bundles_post_ra>
// kernel: tpu_custom_call.1
= control target key start
LH: loop header
LB: loop body
LE: loop exit
PB: predicated region body
PF: predicated region fallthrough
CT: control target
= control target key end

     0   :  { %8 = vsyncpa [#allocation3], 0  ;;  %s726_s0 = inlined_call_operand.hbm [shape: f32[6,16], index: 0, kind: input, shape index: {}]   ;;  %s727_s1 = inlined_call_operand.hbm [shape: f32[4,16,32], index: 1, kind: input, shape index: {}]   ;;  %s728_s2 = inlined_call_operand.hbm [shape: f32[4,1,32], index: 2, kind: input, shape index: {}]   ;;  %s729_s3 = inlined_call_operand.vmem [shape: f32[4,6,32], index: 3, kind: output, shape index: {}]  }
   0x1   :  { %9 = vsyncpa [#allocation5], 0 }
   0x2   :  { %11 = vsyncpa [#allocation5 + $0x1], 0  ;;  %s590_s12 = smov 0   ;;  %s592_s13 = smov 0  }
   0x3   :  { %s594_s14 = smov 0   ;;  %s596_s15 = smov 0  }
   0x4 LB: > { %s611_s16 = sadd.s32 1, %s565_s15   ;;  %s45_s17 = sadd.s32 1, %s561_s14  ;;  %s565_s15 = sphi %s596_s15, %s736_s15   ;;  %s561_s14 = sphi %s594_s14, %s735_s14   ;;  %s557_s13 = sphi %s592_s13, %s734_s13   ;;  %s553_s12 = sphi %s590_s12, %s733_s12  }
   0x5   : > { %s42_s18 = ssub.s32 %s565_s15, %s611_s16  ;;  %p52_p0 = scmp.ne.s32.totalorder %s561_s14, %s557_s13 }
   0x6   : > { %p43_p1 = scmp.eq.s32.totalorder %s42_s18, 0  ;;  %p53_p2 = scmp.eq.s32.totalorder %s565_s15, 0 }
   0x7   : > { %p399_p3 = scmp.lt.s32.totalorder %s565_s15, 4  ;;  %s146_s20 = sand.u32 1, %s565_s15  }
   0x8   : > { %s621_s19 = scalar_select %p43_p1, %s561_s14, %s45_s17  }
   0x9   : > { %p54_p4 = por %p53_p2, %p52_p0  ;;  %s148_s21 = sand.u32 1, %s561_s14  }
   0xa   : > { %s368_s22 = sshll.u32 %s148_s21, 4  ;;  %s378_s23 = sshll.u32 %s565_s15, 4 }
   0xb   : > { %s155_s26 = scalar_lea.hbm %s727_s1, %s378_s23  ;;  %s150_s28 = scalar_lea.vmem [#allocation4], %s368_s22 }
   0xc   : > { %s156_s27 = sshll.u32 %s155_s26, 4  ;;  %s158_s29 = sshll.u32 %s150_s28, 4  ;;  %s157_s27 = int_to_ptr.hbm [resolvable:$true] %s156_s27  ;;  %s159_s29 = int_to_ptr.vmem [resolvable:$true] %s158_s29 }
   0xd   : > { %p633_p5 = pnand %p399_p3, %p54_p4  ;;  %s637_s4 = scalar_lea.sflag [#allocation5], %s146_s20 }
   0xe   : > { %s437_s5 = sshra.s32 %s157_s27, 4  ;;  %s444_s9 = scalar_lea.hbm %s727_s1, 64  ;;  %s438_s5 = int_to_ptr.hbm [resolvable:$true] %s437_s5 }
   0xf   : > { %s439_s6 = scalar_lea.hbm %s438_s5, 16  ;;  %p441_p7 = pneg %p633_p5 }
  0x10   : > { %p440_p6 = scmp.ne.s32.totalorder %s438_s5, %s439_s6  ;;  %p445_p10 = scmp.lt.s32.totalorder %s438_s5, %s727_s1 }
  0x11   : > { %p446_p11 = scmp.lt.s32.totalorder %s444_s9, %s439_s6 }
  0x12   : > { %p442_p8 = pnand %p441_p7, %p440_p6 }
  0x13   : > { %p447_p12 = por %p446_p11, %p445_p10 }
  0x14   : > { %p443_p9 = pneg %p442_p8 }
  0x16   : > { %p448_p13 = pnand %p447_p12, %p443_p9 }
  0x18   : > { %451 = shalt.err (!%p448_p13)
}
  0x19   : > { %s567_s17 = smov 128   ;;  %s568_s18 = smov 8  }
  0x1a   : > { %394 = dma.hbm_to_vmem [thread:$0]  (!%p633_p5), %s157_s27, 256, %s159_s29, %s637_s4, %s567_s17, %s567_s17, %s568_s18  }
  0x1b   : > { %s654_s20 = sadd.s32 4294967295, %s565_s15   ;;  %p58_p0 = scmp.ne.s32.totalorder %s557_s13, %s553_s12 }
  0x1c   : > { %p59_p1 = scmp.eq.s32.totalorder %s654_s20, 0  ;;  %p365_p2 = scmp.ge.s32.totalorder %s565_s15, 1 }
  0x1d   : > { %p121_p3 = scmp.lt.s32.totalorder %s565_s15, 5  ;;  %s133_s25 = sshll.u32 %s726_s0, 4  ;;  %s134_s25 = int_to_ptr.hbm [resolvable:$true] %s133_s25 }
  0x1e   : > { %p663_p4 = por %p59_p1, %p58_p0  ;;  %s569_s12 = smov [#allocation2]  }
  0x1f   : > { %p670_p6 = pnand %p365_p2, %p121_p3  ;;  %s135_s27 = sshll.u32 %s569_s12, 4  ;;  %s136_s27 = int_to_ptr.vmem [resolvable:$true] %s135_s27 }
  0x20   : > { %s174_s5 = scalar_lea.hbm %s728_s2, %s565_s15  ;;  %s171_s7 = scalar_lea.vmem [#allocation6], %s148_s21 }
  0x21   : > { %p387_p8 = pneg %p670_p6  ;;  %s176_s6 = sshll.u32 %s174_s5, 4  ;;  %s177_s6 = int_to_ptr.hbm [resolvable:$true] %s176_s6 }
  0x22   : > { %s178_s8 = sshll.u32 %s171_s7, 4  ;;  %s497_s9 = sshra.s32 %s177_s6, 4  ;;  %s179_s8 = int_to_ptr.vmem [resolvable:$true] %s178_s8  ;;  %s498_s9 = int_to_ptr.hbm [resolvable:$true] %s497_s9 }
  0x23   : > { %p388_p9 = pnand %p387_p8, %p59_p1  ;;  %s499_s10 = scalar_lea.hbm %s498_s9, 1 }
  0x24   : > { %p500_p10 = scmp.ne.s32.totalorder %s498_s9, %s499_s10  ;;  %s504_s15 = scalar_lea.hbm %s728_s2, 4 }
  0x25   : > { %390 = dma.hbm_to_vmem [thread:$0]  (!%p388_p9), %s134_s25, 128, %s136_s27, [#allocation3]  }
  0x26   : > { %p502_p11 = pnand %p500_p10, %p441_p7  ;;  %p505_p13 = scmp.lt.s32.totalorder %s498_s9, %s728_s2 }
  0x27   : > { %p506_p0 = scmp.lt.s32.totalorder %s504_s15, %s499_s10 }
  0x28   : > { %p503_p12 = pneg %p502_p11 }
  0x29   : > { %p507_p2 = por %p506_p0, %p505_p13 }
  0x2b   : > { %p508_p3 = pnand %p507_p2, %p503_p12 }
  0x2d   : > { %511 = shalt.err (!%p508_p3)
}
  0x2e   : > { %397 = dma.hbm_to_vmem [thread:$0]  (!%p633_p5), %s177_s6, 16, %s179_s8, %s637_s4  }
  0x2f   : > { %187 = sbr.rel (%p670_p6) target bundleno = 190 (0xbe), region = 32 }
  0x34   : > { %544 = dma.done.wait (%p59_p1), [#allocation3], 128  }
  0x35   : > { %546 = vsyncadd (%p59_p1), [#allocation3], 4294967168  ;;  %s194_s21 = sand.u32 1, %s654_s20   ;;  %s196_s24 = sand.u32 1, %s557_s13  }
  0x36   : > { %s373_s25 = sshll.u32 %s196_s24, 4  ;;  %s195_s12 = scalar_lea.sflag [#allocation5], %s194_s21 }
  0x37   : > { %s198_s27 = scalar_lea.vmem [#allocation4], %s373_s25 }
  0x38   : > { %548 = dma.done.wait (%p663_p4), %s195_s12, 272  }
  0x39   : > { %550 = vsyncadd (%p663_p4), %s195_s12, 4294967024  ;;  %v240_v0 = vld [vmem:[%s198_s27 + $0x8] sm:$0xff]  ;;  %v239_v1 = vld [vmem:[%s198_s27] sm:$0xff]  ;;  %vm245_vm0 = vcmask 130048   ;;  %s207_s30 = scalar_lea.vmem [#allocation6], %s196_s24  ;;  %p234_p5 = scmp.lt.s32.totalorder %s654_s20, 3 }
  0x3a   : > { %263 = vmatpush.msra.mxu0 %v240_v0  ;;  %v238_v2 = vld [vmem:[#allocation2] sm:$0x3f]  ;;  %vm269_vm1 = vcmask 259072  }
  0x3b   : > { %s738_s20 = smov (!%p234_p5, %s654_s20), 3  ;;  %v436_v3 = vld [vmem:[%s207_s30] ss:$0 sm:$0xff] }
  0x3c   : > { %264 = vmatpush.msra.mxu0 %v239_v1  ;;  %s374_s4 = sshll.u32 %s738_s20, 3 }
  0x3d   : > { %375 = vmatmul.msk.f32.vlgmr.msra.gmra.mxu0 %vm245_vm0, %v238_v2  ;;  %s237_s29 = scalar_lea.vmem %s729_s3, %s374_s4 }
  0xba   : > { %v266_v4 = vpop.f32.mrf.mxu0 }
  0xbb   : > { %v267_v5 = vadd.f32 %v436_v3, %v266_v4 }
  0xbd   : > { %270 = vst.msk [vmem:[%s237_s29] sm:$0x3f] %vm269_vm1, %v267_v5 }
  0xbe PF: > { %p14_p7 = scmp.ge.s32.totalorder %s611_s16, 6   ;;  %s733_s12 = smov %s557_s13 }
  0xbf   : > { %s734_s13 = smov %s561_s14  ;;  %s735_s14 = smov %s621_s19 }
  0xc0   : > { %s736_s15 = smov %s611_s16  ;;  %16 = sbr.rel (!%p14_p7) target bundleno = 4 (0x4), region = 88 }
  0xc5   :  { %290 = vsyncpa [#allocation3], 1 }
  0xc6   :  { %292 = vsyncpa [#allocation3 + $0x1], 1 }
  0xc7   :  { %293 = vsyncpa [#allocation5], 1 }
  0xc8   :  { %295 = vsyncpa [#allocation5 + $0x1], 1 }

</bundles_post_ra>
